<compile_context>
chip_gen: v6e
topology: v6e:2x2x1
jax: 0.10.0
libtpu: 0.0.40
codegen_flags: <defaults>
</compile_context>

<pallas_src>
import numpy as np
import jax
import jax.numpy as jnp
from jax.experimental import pallas as pl
from jax.experimental.pallas import tpu as pltpu

BATCH = 2
SEQ_LEN = 16
D_MODEL = 32
KERNEL_SIZE = 25   # Autoformer series_decomp default
STRIDE = 1


def _build_avg_matrix(seq_len, kernel_size, stride):
    """[L_out, L] matrix A such that A @ x == moving_avg(x) (replicate pad)."""
    pad = (kernel_size - 1) // 2
    l_out = (seq_len + 2 * pad - kernel_size) // stride + 1
    a = np.zeros((l_out, seq_len), np.float32)
    w = np.float32(1.0 / kernel_size)
    for i in range(l_out):
        for t in range(kernel_size):
            # padded index i*stride + t maps to clamped original index
            j = min(max(i * stride + t - pad, 0), seq_len - 1)
            a[i, j] += w
    return jnp.asarray(a), l_out


def moving_avg_kernel(a_ref, x_ref, o_ref):
    # a_ref: [L_out, L]   averaging matrix (pad + mean baked in)
    # x_ref: [L, B*D]     sequence-major, batch folded into lanes
    # o_ref: [L_out, B*D]
    o_ref[...] = jnp.dot(a_ref[...], x_ref[...],
                         preferred_element_type=jnp.float32).astype(o_ref.dtype)


def moving_avg(x, kernel_size=KERNEL_SIZE, stride=STRIDE):
    b, l, d = x.shape
    a, l_out = _build_avg_matrix(l, kernel_size, stride)
    # Layout plumbing only: [B, L, D] -> [L, B*D] so one lane-dense matmul
    # in a single invocation handles the whole batch.
    x_flat = jnp.transpose(x, (1, 0, 2)).reshape(l, b * d)
    out_flat = pl.pallas_call(
        moving_avg_kernel,
        out_shape=jax.ShapeDtypeStruct((l_out, b * d), x.dtype),
        grid=(1,),
        in_specs=[
            pl.BlockSpec((l_out, l), lambda i: (0, 0)),
            pl.BlockSpec((l, b * d), lambda i: (0, 0)),
        ],
        out_specs=pl.BlockSpec((l_out, b * d), lambda i: (0, 0)),
        compiler_params=pltpu.CompilerParams(
            dimension_semantics=("arbitrary",)),
    )(a, x_flat)
    return jnp.transpose(out_flat.reshape(l_out, b, d), (1, 0, 2))


def _moving_avg_ref(x, kernel_size=KERNEL_SIZE, stride=STRIDE):
    """Pure-JAX reference matching the PyTorch module exactly."""
    pad = (kernel_size - 1) // 2
    front = jnp.repeat(x[:, 0:1, :], pad, axis=1)
    end = jnp.repeat(x[:, -1:, :], pad, axis=1)
    xp = jnp.concatenate([front, x, end], axis=1)
    l_out = (xp.shape[1] - kernel_size) // stride + 1
    windows = [xp[:, i * stride:i * stride + kernel_size, :].mean(axis=1)
               for i in range(l_out)]
    return jnp.stack(windows, axis=1)


if __name__ == "__main__":
    key = jax.random.PRNGKey(0)
    x = jax.random.normal(key, (BATCH, SEQ_LEN, D_MODEL), dtype=jnp.float32)

    out = moving_avg(x)
    jax.block_until_ready(out)

    pad = (KERNEL_SIZE - 1) // 2
    l_out = (SEQ_LEN + 2 * pad - KERNEL_SIZE) // STRIDE + 1
    assert out.shape == (BATCH, l_out, D_MODEL), out.shape

    ref = _moving_avg_ref(x)
    max_err = float(jnp.max(jnp.abs(out - ref)))
    assert max_err < 3e-3, f"max |err| = {max_err}"

    print("KERNEL_OK")
</pallas_src>

<mosaic_0001>
module attributes {stable_mosaic.version = 11 : i64} {
  func.func @moving_avg_kernel(%arg0: i32, %arg1: memref<16x16xf32, #tpu.memory_space<vmem>>, %arg2: memref<16x64xf32, #tpu.memory_space<vmem>>, %arg3: memref<16x64xf32, #tpu.memory_space<vmem>>) attributes {dimension_semantics = [#tpu.dimension_semantics<arbitrary>], iteration_bounds = array<i64: 1>, scalar_prefetch = 0 : i64, scratch_operands = 0 : i64, tpu.core_type = #tpu.core_type<tc>, window_params = [{pipeline_mode = #tpu.pipeline_mode<synchronous>, transform_indices = @transform_0, window_bounds = array<i64: 16, 16>}, {pipeline_mode = #tpu.pipeline_mode<synchronous>, transform_indices = @transform_1, window_bounds = array<i64: 16, 64>}, {pipeline_mode = #tpu.pipeline_mode<synchronous>, transform_indices = @transform_2, window_bounds = array<i64: 16, 64>}]} {
    %c0 = arith.constant 0 : index
    %c0_0 = arith.constant 0 : index
    %0 = vector.load %arg1[%c0, %c0_0] : memref<16x16xf32, #tpu.memory_space<vmem>>, vector<16x16xf32>
    %c0_1 = arith.constant 0 : index
    %c0_2 = arith.constant 0 : index
    %1 = vector.load %arg2[%c0_1, %c0_2] : memref<16x64xf32, #tpu.memory_space<vmem>>, vector<16x64xf32>
    %cst = arith.constant dense<0.000000e+00> : vector<16x64xf32>
    %2 = tpu.matmul %0, %1, %cst {dimension_numbers = #tpu.dot_dimension_numbers<[1], [0], [0], [1], [0, 0, 1, 1], [], []>} : vector<16x16xf32>, vector<16x64xf32>, vector<16x64xf32> -> vector<16x64xf32>
    %c0_3 = arith.constant 0 : index
    %c0_4 = arith.constant 0 : index
    %3 = vector.load %arg3[%c0_3, %c0_4] : memref<16x64xf32, #tpu.memory_space<vmem>>, vector<16x64xf32>
    tpu.vector_store %arg3[%c0_3, %c0_4], %2 {strides = array<i32>} : memref<16x64xf32, #tpu.memory_space<vmem>>, vector<16x64xf32>,
    return
  }
  func.func @transform_0(%arg0: i32) -> (i32, i32) {
    %c0_i32 = arith.constant 0 : i32
    %c0_i32_0 = arith.constant 0 : i32
    %c0_i32_1 = arith.constant 0 : i32
    return %c0_i32, %c0_i32_0 : i32, i32
  }
  func.func @transform_1(%arg0: i32) -> (i32, i32) {
    %c0_i32 = arith.constant 0 : i32
    %c0_i32_0 = arith.constant 0 : i32
    %c0_i32_1 = arith.constant 0 : i32
    return %c0_i32, %c0_i32_0 : i32, i32
  }
  func.func @transform_2(%arg0: i32) -> (i32, i32) {
    %c0_i32 = arith.constant 0 : i32
    %c0_i32_0 = arith.constant 0 : i32
    %c0_i32_1 = arith.constant 0 : i32
    return %c0_i32, %c0_i32_0 : i32, i32
  }
}

</mosaic_0001>

<bundles_post_ra>
// kernel: tpu_custom_call.1
= control target key start
LH: loop header
LB: loop body
LE: loop exit
PB: predicated region body
PF: predicated region fallthrough
CT: control target
= control target key end

     0   :  { %7 = vsyncpa [#allocation3], 0  ;;  %s269_s0 = inlined_call_operand.hbm [shape: f32[16,16], index: 0, kind: input, shape index: {}]   ;;  %s270_s1 = inlined_call_operand.hbm [shape: f32[16,64], index: 1, kind: input, shape index: {}]   ;;  %s271_s2 = inlined_call_operand.hbm [shape: f32[16,64], index: 2, kind: output, shape index: {}]  }
   0x1   :  { %8 = vsyncpa [#allocation6], 0 }
   0x2   :  { %9 = vsyncpa [#allocation4], 0  ;;  %s231_s9 = smov [#allocation2]  }
   0x3   :  { %s15_s10 = sshll.u32 %s231_s9, 4  ;;  %s16_s10 = int_to_ptr.vmem [resolvable:$true] %s15_s10 }
   0x4   :  { %s173_s11 = scalar_lea.vmem %s16_s10, 256  ;;  %p178_p1 = scmp.lt.s32.totalorder %s16_s10, %s16_s10 }
   0x5   :  { %p174_p0 = scmp.ne.s32.totalorder %s16_s10, %s173_s11  ;;  %p179_p2 = scmp.lt.s32.totalorder %s173_s11, %s173_s11 }
   0x7   :  { %p180_p3 = por %p179_p2, %p178_p1 }
   0x9   :  { %p181_p4 = pnand %p180_p3, %p174_p0 }
   0xb   :  { %184 = shalt.err (!%p181_p4)
}
   0xc   :  { %s232_s12 = smov 128   ;;  %s233_s13 = smov 8  }
   0xd   :  { %21 = dma.hbm_to_vmem [thread:$0]  %s269_s0, 256, %s16_s10, [#allocation3], %s232_s12, %s232_s12, %s233_s13  }
   0xe   :  { %s234_s16 = smov [#allocation5]  }
   0xf   :  { %s27_s17 = sshll.u32 %s234_s16, 4  ;;  %s28_s17 = int_to_ptr.vmem [resolvable:$true] %s27_s17 }
  0x10   :  { %s193_s18 = scalar_lea.vmem %s28_s17, 256  ;;  %p198_p6 = scmp.lt.s32.totalorder %s28_s17, %s28_s17 }
  0x11   :  { %p194_p5 = scmp.ne.s32.totalorder %s28_s17, %s193_s18  ;;  %p199_p7 = scmp.lt.s32.totalorder %s193_s18, %s193_s18 }
  0x13   :  { %p200_p8 = por %p199_p7, %p198_p6 }
  0x15   :  { %p201_p9 = pnand %p200_p8, %p194_p5 }
  0x17   :  { %204 = shalt.err (!%p201_p9)
}
  0x18   :  { %33 = dma.hbm_to_vmem [thread:$0]  %s270_s1, 256, %s28_s17, [#allocation6], %s232_s12, %s232_s12, %s233_s13  }
  0x19   :  { %225 = dma.done.wait [#allocation3], 256  }
  0x1a   :  { %226 = vsyncadd [#allocation3], 4294967040 }
  0x1b   :  { %227 = dma.done.wait [#allocation6], 256  }
  0x1c   :  { %228 = vsyncadd [#allocation6], 4294967040  ;;  %vm44_vm0 = vcmask 130048   ;;  %v43_v0 = vld [vmem:[#allocation5 + $0x8] sm:$0xff]  ;;  %v42_v1 = vld [vmem:[#allocation5] sm:$0xff]  ;;  %vm126_vm1 = vcmask 523264  }
  0x1d   :  { %v40_v2 = vld [vmem:[#allocation2] sm:$0xff]  ;;  %153 = vmatprep.subr.mxu0 %v43_v0  ;;  %v41_v3 = vld [vmem:[#allocation2 + $0x8] sm:$0xff]  ;;  %s235_s0 = smov [#allocation7]  }
  0x1e   :  { %157 = vmatprep.mubr.msk.f32.mxu0 %vm44_vm0, %v40_v2  ;;  %154 = vmatpush3.msra.mxu0 %v43_v0  ;;  %s134_s21 = sshll.u32 %s235_s0, 4  ;;  %s135_s21 = int_to_ptr.vmem [resolvable:$true] %s134_s21 }
  0x1f   :  { %155 = vmatprep.subr.mxu0 %v42_v1  ;;  %s205_s1 = scalar_lea.vmem %s135_s21, 256  ;;  %p210_p11 = scmp.lt.s32.totalorder %s135_s21, %s135_s21 }
  0x20   :  { %156 = vmatpush3.msra.mxu0 %v42_v1  ;;  %p206_p10 = scmp.ne.s32.totalorder %s135_s21, %s205_s1  ;;  %p211_p12 = scmp.lt.s32.totalorder %s205_s1, %s205_s1 }
  0x21   :  { %158 = vmatmul.mubr.msk.f32.vlgmr.msra.gmra.mxu0 %vm44_vm0, %v41_v3 }
  0x22   :  { %p212_p13 = por %p211_p12, %p210_p11 }
  0x24   :  { %p213_p0 = pnand %p212_p13, %p206_p10 }
  0xe1   :  { %v159_v4 = vpop.f32.mrf.mxu0 }
  0xe2   :  { %128 = vst.msk [vmem:[#allocation7 + $0x8] sm:$0xff] %vm126_vm1, %v159_v4 }
  0xe3   :  { %v117_v5 = vpop.f32.mrf.mxu0 }
  0xe4   :  { %127 = vst.msk [vmem:[#allocation7] sm:$0xff] %vm126_vm1, %v117_v5 }
  0xe5   :  { %216 = shalt.err (!%p213_p0)
}
  0xe6   :  { %140 = dma.vmem_to_hbm [thread:$0]  %s135_s21, 256, %s271_s2, [#allocation4], %s232_s12, %s232_s12, %s233_s13  }
  0xe7   :  { %229 = dma.done.wait [#allocation4], 256  }
  0xe8   :  { %230 = vsyncadd [#allocation4], 4294967040 }
  0xe9   :  { %144 = vsyncpa [#allocation3], 1 }
  0xea   :  { %145 = vsyncpa [#allocation6], 1 }
  0xeb   :  { %146 = vsyncpa [#allocation4], 1 }

</bundles_post_ra>
